<compile_context>
chip_gen: v7x
topology: tpu7x:2x2x1
jax: 0.10.0
libtpu: 0.0.40
codegen_flags: <defaults>
</compile_context>

<pallas_src>
import functools

import jax
import jax.numpy as jnp
from jax.experimental import pallas as pl
from jax.experimental.pallas import tpu as pltpu


def _round_up(x, m):
    return ((x + m - 1) // m) * m


def _split_sum_kernel_aligned(a_ref, b_ref, o_ref):
    # a_ref / b_ref: lane-aligned (tile_r, S) views of the low / high halves of
    # the SAME HBM array (two in_specs over one operand). Pure VPU add.
    o_ref[...] = a_ref[...] + b_ref[...]


def _split_sum_kernel_ragged(x_ref, o_ref, *, split_size):
    # Single (tile_r, 2*S) block; the lane-offset second slice lowers to XLU
    # rotates / a small VMEM copy — free filler under the DMA bound.
    o_ref[...] = x_ref[:, :split_size] + x_ref[:, split_size:]


def split_sum(x, split_size, *, force_pallas=False):
    """Pallas implementation of SplitSum.forward.

    Accepts 2D (N, F) or >=2D (..., F) input; splits the last dim at
    split_size and adds the halves. Requires F == 2 * split_size.
    """
    orig_shape = x.shape
    feat = orig_shape[-1]
    if feat != 2 * split_size:
        raise ValueError("last dim must equal 2 * splitSize")

    rows = 1
    for d in orig_shape[:-1]:
        rows *= d

    itemsize = jnp.dtype(x.dtype).itemsize
    total_bytes = rows * feat * itemsize
    aligned = (split_size % 128 == 0)

    # Dispatch: narrow / misaligned S or tiny inputs -> XLA's fused slice+add
    # (avoids lane padding, masked vst.msk stores and fixed launch overhead).
    if not force_pallas and (not aligned or total_bytes < (4 << 20)):
        return x[..., :split_size] + x[..., split_size:]

    # Flatten leading dims only (contiguous row-major -> no relayout copy).
    x2 = x.reshape(rows, feat)

    sublane = max(8, 32 // itemsize)  # 8 f32, 16 bf16, 32 int8/fp8

    # Per-row VMEM bytes including lane padding on the ragged path.
    if aligned:
        in_row_bytes = feat * itemsize           # two unpadded half blocks
        out_row_bytes = split_size * itemsize
    else:
        in_row_bytes = _round_up(feat, 128) * itemsize
        out_row_bytes = _round_up(split_size, 128) * itemsize

    # ~3 MiB of input block per step: amortizes the ~0.35 us per-step overhead
    # while keeping the double-buffered footprint well under v5e's 16 MiB.
    target_in_block_bytes = 3 << 20
    tile_r = max(sublane,
                 (target_in_block_bytes // in_row_bytes) // sublane * sublane)
    # Keep >= ~8 grid steps for medium inputs so the parallel grid axis can
    # shard across v7x's two TensorCores (neutral on single-TC v5e/v6e).
    tile_r = min(tile_r, max(sublane, _round_up(pl.cdiv(rows, 8), sublane)))
    # Never larger than the (sublane-rounded) row count.
    tile_r = min(tile_r, max(sublane, _round_up(rows, sublane)))

    # Ragged last block: reads padded, writes masked by Pallas (no jnp.pad).
    grid = (pl.cdiv(rows, tile_r),)

    # Explicit VMEM limit from the actual double-buffered footprint + headroom
    # (respects v5e's 16 MiB default scoped VMEM by construction).
    step_bytes = tile_r * (in_row_bytes + out_row_bytes)
    vmem_limit = max(4 << 20, int(2 * step_bytes * 1.5) + (1 << 20))

    cost = pl.CostEstimate(
        flops=rows * split_size,
        transcendentals=0,
        bytes_accessed=rows * (feat + split_size) * itemsize)

    if aligned:
        kernel = _split_sum_kernel_aligned
        in_specs = [
            pl.BlockSpec((tile_r, split_size), lambda i: (i, 0)),  # low half
            pl.BlockSpec((tile_r, split_size), lambda i: (i, 1)),  # high half
        ]
        operands = (x2, x2)  # same array, two lane-aligned views
    else:
        kernel = functools.partial(_split_sum_kernel_ragged,
                                   split_size=split_size)
        in_specs = [pl.BlockSpec((tile_r, feat), lambda i: (i, 0))]
        operands = (x2,)

    out = pl.pallas_call(
        kernel,
        out_shape=jax.ShapeDtypeStruct((rows, split_size), x.dtype),
        grid_spec=pltpu.PrefetchScalarGridSpec(
            num_scalar_prefetch=0,
            grid=grid,
            in_specs=in_specs,
            out_specs=pl.BlockSpec((tile_r, split_size), lambda i: (i, 0)),
        ),
        compiler_params=pltpu.CompilerParams(
            dimension_semantics=("parallel",),
            vmem_limit_bytes=vmem_limit),
        cost_estimate=cost,
    )(*operands)

    return out.reshape(*orig_shape[:-1], split_size)


def split_sum_ref(x, split_size):
    # Pure-JAX reference mirroring the PyTorch forward.
    return x[..., :split_size] + x[..., split_size:]


if __name__ == "__main__":
    key = jax.random.PRNGKey(0)
    k1, k2, k3, k4 = jax.random.split(key, 4)

    # (a) Aligned path (S % 128 == 0), 3D input, forced through the Pallas
    #     kernel: batch=2, seq=8, hidden=2*128.
    s_al = 128
    xa = jax.random.normal(k1, (2, 8, 2 * s_al), dtype=jnp.float32)
    ya = split_sum(xa, s_al, force_pallas=True)
    jax.block_until_ready(ya)
    assert ya.shape == (2, 8, s_al)
    assert jnp.allclose(ya, split_sum_ref(xa, s_al), atol=1e-6), "aligned 3D mismatch"

    # (b) Ragged-S path (S % 128 != 0), 2D input, forced through Pallas.
    s_rg = 32
    xb = jax.random.normal(k2, (16, 2 * s_rg), dtype=jnp.float32)
    yb = split_sum(xb, s_rg, force_pallas=True)
    jax.block_until_ready(yb)
    assert yb.shape == (16, s_rg)
    assert jnp.allclose(yb, split_sum_ref(xb, s_rg), atol=1e-6), "ragged 2D mismatch"

    # (c) Masked last grid block (rows=15 not a multiple of the tile), aligned S.
    xc = jax.random.normal(k3, (3, 5, 2 * s_al), dtype=jnp.float32)
    yc = split_sum(xc, s_al, force_pallas=True)
    jax.block_until_ready(yc)
    assert yc.shape == (3, 5, s_al)
    assert jnp.allclose(yc, split_sum_ref(xc, s_al), atol=1e-6), "masked-tail mismatch"

    # (d) Default dispatch: tiny / narrow-S input falls back to fused slice+add.
    xd = jax.random.normal(k4, (4, 2 * s_rg), dtype=jnp.float32)
    yd = split_sum(xd, s_rg)
    jax.block_until_ready(yd)
    assert yd.shape == (4, s_rg)
    assert jnp.allclose(yd, split_sum_ref(xd, s_rg), atol=1e-6), "fallback mismatch"

    print("KERNEL_OK")
</pallas_src>

<mosaic_0001>
module attributes {stable_mosaic.version = 11 : i64} {
  func.func @_split_sum_kernel_aligned(%arg0: i32, %arg1: memref<8x128xf32, #tpu.memory_space<vmem>>, %arg2: memref<8x128xf32, #tpu.memory_space<vmem>>, %arg3: memref<8x128xf32, #tpu.memory_space<vmem>>) attributes {dimension_semantics = [#tpu.dimension_semantics<parallel>], iteration_bounds = array<i64: 2>, scalar_prefetch = 0 : i64, scratch_operands = 0 : i64, tpu.core_type = #tpu.core_type<tc>, window_params = [{transform_indices = @transform_0, window_bounds = array<i64: 8, 128>}, {transform_indices = @transform_1, window_bounds = array<i64: 8, 128>}, {transform_indices = @transform_2, window_bounds = array<i64: 8, 128>}]} {
    %c0 = arith.constant 0 : index
    %c0_0 = arith.constant 0 : index
    %0 = vector.load %arg1[%c0, %c0_0] : memref<8x128xf32, #tpu.memory_space<vmem>>, vector<8x128xf32>
    %c0_1 = arith.constant 0 : index
    %c0_2 = arith.constant 0 : index
    %1 = vector.load %arg2[%c0_1, %c0_2] : memref<8x128xf32, #tpu.memory_space<vmem>>, vector<8x128xf32>
    %2 = arith.addf %0, %1 : vector<8x128xf32>
    %c0_3 = arith.constant 0 : index
    %c0_4 = arith.constant 0 : index
    %3 = vector.load %arg3[%c0_3, %c0_4] : memref<8x128xf32, #tpu.memory_space<vmem>>, vector<8x128xf32>
    tpu.vector_store %arg3[%c0_3, %c0_4], %2 {strides = array<i32>} : memref<8x128xf32, #tpu.memory_space<vmem>>, vector<8x128xf32>,
    return
  }
  func.func @transform_0(%arg0: i32) -> (i32, i32) {
    %c0_i32 = arith.constant 0 : i32
    %c0_i32_0 = arith.constant 0 : i32
    return %arg0, %c0_i32 : i32, i32
  }
  func.func @transform_1(%arg0: i32) -> (i32, i32) {
    %c1_i32 = arith.constant 1 : i32
    %c0_i32 = arith.constant 0 : i32
    return %arg0, %c1_i32 : i32, i32
  }
  func.func @transform_2(%arg0: i32) -> (i32, i32) {
    %c0_i32 = arith.constant 0 : i32
    %c0_i32_0 = arith.constant 0 : i32
    return %arg0, %c0_i32 : i32, i32
  }
}

</mosaic_0001>

<bundles_post_ra>
// kernel: tpu_custom_call.1
= control target key start
LH: loop header
LB: loop body
LE: loop exit
PB: predicated region body
PF: predicated region fallthrough
CT: control target
= control target key end

     0   :  { %7 = vsyncpa [#allocation3], 0  ;;  %s741_s0 = inlined_call_operand.hbm [shape: f32[16,256], index: 0, kind: input, shape index: {}]   ;;  %s742_s1 = inlined_call_operand.hbm [shape: f32[16,256], index: 1, kind: input, shape index: {}]   ;;  %s743_s2 = inlined_call_operand.hbm [shape: f32[16,128], index: 2, kind: output, shape index: {}]  }
   0x1   :  { %9 = vsyncpa [#allocation3 + $0x1], 0 }
   0x2   :  { %10 = vsyncpa [#allocation6], 0 }
   0x3   :  { %12 = vsyncpa [#allocation6 + $0x1], 0 }
   0x4   :  { %13 = vsyncpa [#allocation4], 0 }
   0x5   :  { %15 = vsyncpa [#allocation4 + $0x1], 0  ;;  %s533_s9 = smov 0   ;;  %s535_s10 = smov 0  }
   0x6   :  { %s537_s11 = smov 0   ;;  %s539_s12 = smov 0  }
   0x7 LB: > { %s554_s13 = sadd.s32 4294967295, %s513_s12   ;;  %s312_s14 = sadd.s32 4294967294, %s513_s12   ;;  %s513_s12 = sphi %s539_s12, %s762_s12   ;;  %s509_s11 = sphi %s537_s11, %s761_s11   ;;  %s505_s10 = sphi %s535_s10, %s760_s10   ;;  %s501_s9 = sphi %s533_s9, %s759_s9  }
   0x8   : > { %s558_s15 = sadd.s32 1, %s513_s12   ;;  %s28_s16 = sadd.s32 1, %s509_s11 }
   0x9   : > { %s25_s17 = ssub.s32 %s513_s12, %s558_s15  ;;  %p35_p0 = scmp.ne.s32.totalorder %s509_s11, %s505_s10 }
   0xa   : > { %p26_p1 = scmp.eq.s32.totalorder %s25_s17, 0  ;;  %p36_p2 = scmp.eq.s32.totalorder %s513_s12, 0 }
   0xb   : > { %p41_p3 = scmp.ne.s32.totalorder %s505_s10, %s501_s9  ;;  %p42_p4 = scmp.eq.s32.totalorder %s554_s13, 0 }
   0xc   : > { %s570_s18 = scalar_select %p26_p1, %s509_s11, %s28_s16  }
   0xd   : > { %p572_p5 = por %p36_p2, %p35_p0  ;;  %p576_p6 = por %p42_p4, %p41_p3 }
   0xe   : > { %p91_p7 = scmp.eq.s32.totalorder %s554_s13, 1  ;;  %p97_p8 = scmp.eq.s32.totalorder %s312_s14, 1 }
   0xf   : > { %s747_s20 = scalar_select %p576_p6, 1, 0 }
  0x10   : > { %p348_p10 = scmp.lt.s32.totalorder %s513_s12, 2  ;;  %p583_p11 = por %p91_p7, %p35_p0 }
  0x11   : > { %p587_p12 = por %p97_p8, %p41_p3  ;;  %s592_s23 = sand.u32 1, %s509_s11  }
  0x12   : > { %s748_s21 = scalar_select %p583_p11, 1, 0 }
  0x13   : > { %s749_s22 = scalar_select %p587_p12, 1, 0 }
  0x14   : > { %s329_s24 = sshll.u32 %s513_s12, 8  ;;  %s315_s25 = sshll.u32 %s592_s23, 3 }
  0x15   : > { %s601_s28 = scalar_lea.hbm %s741_s0, %s329_s24  ;;  %s121_s29 = scalar_lea.vmem [#allocation2], %s315_s25 }
  0x16   : > { %s129_s30 = sshll.u32 %s121_s29, 4  ;;  %p607_p13 = pnand %p348_p10, %p572_p5  ;;  %s611_s30 = int_to_ptr.vmem [resolvable:$true] %s129_s30 }
  0x17   : > { %s118_s4 = scalar_lea.sflag [#allocation3], %s592_s23  ;;  %s382_s5 = scalar_lea.hbm %s601_s28, 128 }
  0x18   : > { %p383_p2 = scmp.ne.s32.totalorder %s601_s28, %s382_s5  ;;  %p384_p3 = pneg %p607_p13 }
  0x19   : > { %s387_s8 = scalar_lea.hbm %s741_s0, 512  ;;  %p388_p5 = scmp.lt.u32.totalorder %s601_s28, %s741_s0 }
  0x1a   : > { %p385_p4 = pnand %p384_p3, %p383_p2  ;;  %p389_p8 = scmp.lt.u32.totalorder %s387_s8, %s382_s5 }
  0x1b   : > { %p391_p9 = scmp.lt.u32.totalorder %s382_s5, %s601_s28 }
  0x1c   : > { %p386_p7 = pneg %p385_p4  ;;  %p390_p10 = por %p389_p8, %p388_p5 }
  0x1e   : > { %p392_p0 = por %p391_p9, %p390_p10 }
  0x20   : > { %p393_p1 = pnand %p392_p0, %p386_p7 }
  0x22   : > { %396 = shalt.err (!%p393_p1)
}
  0x23   : > { %s397_s17 = scalar_lea.vmem %s611_s30, 128  ;;  %s515_s19 = smov [#allocation2]  }
  0x24   : > { %p398_p2 = scmp.ne.s32.totalorder %s611_s30, %s397_s17  ;;  %s402_s26 = sshll.u32 %s515_s19, 4  ;;  %s403_s26 = int_to_ptr.vmem [resolvable:$false] %s402_s26 }
  0x25   : > { %s404_s27 = scalar_lea.vmem %s403_s26, 256  ;;  %p405_p11 = scmp.lt.s32.totalorder %s611_s30, %s403_s26 }
  0x26   : > { %p400_p4 = pnand %p398_p2, %p384_p3  ;;  %p406_p5 = scmp.lt.s32.totalorder %s404_s27, %s397_s17 }
  0x28   : > { %p401_p12 = pneg %p400_p4  ;;  %p407_p8 = por %p406_p5, %p405_p11 }
  0x2a   : > { %p408_p9 = pnand %p407_p8, %p401_p12 }
  0x2c   : > { %411 = shalt.err (!%p408_p9)
}
  0x2d   : > { %340 = dma.hbm_to_vmem [thread:$0]  (!%p607_p13), %s601_s28, 128, %s611_s30, %s118_s4  }
  0x2e   : > { %p751_p0 = scmp.lt.s32.totalorder %s513_s12, 3  ;;  %p752_p1 = scmp.ge.s32.totalorder %s513_s12, 1 }
  0x2f   : > { %s254_s7 = scalar_lea.hbm %s742_s1, %s329_s24  ;;  %s140_s14 = scalar_lea.vmem [#allocation5], %s315_s25 }
  0x30   : > { %p645_p7 = pnand %p752_p1, %p751_p0  ;;  %s654_s8 = scalar_lea.hbm %s254_s7, 128 }
  0x31   : > { %s149_s16 = sshll.u32 %s140_s14, 4  ;;  %s137_s28 = scalar_lea.sflag [#allocation6], %s592_s23  ;;  %s150_s16 = int_to_ptr.vmem [resolvable:$true] %s149_s16 }
  0x32   : > { %s753_s29 = scalar_select %p645_p7, 1, 0 }
  0x33   : > { %s442_s30 = scalar_lea.hbm %s254_s7, 256  ;;  %s417_s24 = scalar_lea.hbm %s742_s1, 512 }
  0x34   : > { %p413_p11 = scmp.ne.s32.totalorder %s654_s8, %s442_s30  ;;  %p418_p2 = scmp.lt.u32.totalorder %s654_s8, %s742_s1 }
  0x35   : > { %p419_p4 = scmp.lt.u32.totalorder %s417_s24, %s442_s30  ;;  %p421_p8 = scmp.lt.u32.totalorder %s442_s30, %s654_s8 }
  0x36   : > { %p415_p12 = pnand %p413_p11, %p384_p3 }
  0x37   : > { %p420_p5 = por %p419_p4, %p418_p2 }
  0x38   : > { %p416_p10 = pneg %p415_p12 }
  0x39   : > { %p422_p9 = por %p421_p8, %p420_p5 }
  0x3b   : > { %p423_p0 = pnand %p422_p9, %p416_p10 }
  0x3d   : > { %426 = shalt.err (!%p423_p0)
}
  0x3e   : > { %s427_s23 = scalar_lea.vmem %s150_s16, 128  ;;  %s516_s25 = smov [#allocation5]  }
  0x3f   : > { %p428_p1 = scmp.ne.s32.totalorder %s150_s16, %s427_s23  ;;  %s432_s27 = sshll.u32 %s516_s25, 4  ;;  %s433_s27 = int_to_ptr.vmem [resolvable:$false] %s432_s27 }
  0x40   : > { %s434_s5 = scalar_lea.vmem %s433_s27, 256  ;;  %p435_p6 = scmp.lt.s32.totalorder %s150_s16, %s433_s27 }
  0x41   : > { %p430_p11 = pnand %p428_p1, %p384_p3  ;;  %p436_p7 = scmp.lt.s32.totalorder %s434_s5, %s427_s23 }
  0x43   : > { %p431_p12 = pneg %p430_p11  ;;  %p437_p2 = por %p436_p7, %p435_p6 }
  0x45   : > { %p438_p4 = pnand %p437_p2, %p431_p12 }
  0x47   : > { %441 = shalt.err (!%p438_p4)
}
  0x48   : > { %343 = dma.hbm_to_vmem [thread:$0]  (!%p607_p13), %s654_s8, 128, %s150_s16, %s137_s28  }
  0x49   : > { %p754_p10 = scmp.ne.s32.totalorder %s753_s29, 0 }
  0x4a   : > { %s680_s6 = sand.u32 (!%p754_p10), 1, %s505_s10   ;;  %p755_p3 = scmp.ne.s32.totalorder (!%p754_p10), %s747_s20, 0 }
  0x4b   : > { %158 = sbr.rel (%p754_p10) target bundleno = 111 (0x6f), region = 28  ;;  %s322_s7 = sshll.u32 (!%p754_p10), %s680_s6, 3 }
  0x4c   : > { %s161_s14 = scalar_lea.sflag (!%p754_p10), [#allocation3], %s680_s6  ;;  %s164_s30 = scalar_lea.vmem (!%p754_p10), [#allocation2], %s322_s7 }
  0x52   : > { %488 = dma.done.wait (%p755_p3), %s161_s14, 128  }
  0x53   : > { %490 = vsyncadd (%p755_p3), %s161_s14, 4294967168  ;;  %s170_s3 = scalar_lea.sflag [#allocation6], %s680_s6  ;;  %s173_s8 = scalar_lea.vmem [#allocation5], %s322_s7 }
  0x54   : > { %492 = dma.done.wait (%p755_p3), %s170_s3, 128  }
  0x55   : > { %494 = vsyncadd (%p755_p3), %s170_s3, 4294967168  ;;  %s198_s29 = scalar_lea.vmem [#allocation7], %s322_s7  ;;  %s326_s28 = sshll.u32 %s554_s13, 7  ;;  %v199_v0 = vld [vmem:[%s164_s30] sm:$0xff]  ;;  %v200_v1 = vld [vmem:[%s173_s8] sm:$0xff] }
  0x56   : > { %s217_s16 = sshll.u32 %s198_s29, 4  ;;  %v201_v2 = vadd.f32 %v200_v1, %v199_v0  ;;  %s699_s24 = scalar_lea.hbm %s743_s2, %s326_s28  ;;  %s694_s16 = int_to_ptr.vmem [resolvable:$true] %s217_s16 }
  0x57   : > { %s204_s20 = scalar_lea.sflag [#allocation4], %s680_s6  ;;  %s443_s19 = scalar_lea.vmem %s694_s16, 128 }
  0x58   : > { %202 = vst [vmem:[%s198_s29] sm:$0xff] %v201_v2  ;;  %p444_p6 = scmp.ne.s32.totalorder %s694_s16, %s443_s19  ;;  %p756_p13 = scmp.ne.s32.totalorder %s748_s21, 0 }
  0x59   : > { %s517_s13 = smov [#allocation7]  }
  0x5a   : > { %p445_p7 = pnand %p444_p6, %p756_p13  ;;  %s447_s26 = sshll.u32 %s517_s13, 4  ;;  %s448_s26 = int_to_ptr.vmem [resolvable:$false] %s447_s26 }
  0x5b   : > { %s449_s23 = scalar_lea.vmem %s448_s26, 256  ;;  %p450_p8 = scmp.lt.s32.totalorder %s694_s16, %s448_s26 }
  0x5c   : > { %p446_p5 = pneg %p445_p7  ;;  %p451_p9 = scmp.lt.s32.totalorder %s449_s23, %s443_s19 }
  0x5e   : > { %p452_p0 = por %p451_p9, %p450_p8 }
  0x60   : > { %p453_p1 = pnand %p452_p0, %p446_p5 }
  0x62   : > { %456 = shalt.err (!%p453_p1)
}
  0x63   : > { %s457_s25 = scalar_lea.hbm %s699_s24, 128  ;;  %s461_s6 = scalar_lea.hbm %s743_s2, 256 }
  0x64   : > { %p458_p11 = scmp.ne.s32.totalorder %s699_s24, %s457_s25  ;;  %p462_p4 = scmp.lt.u32.totalorder %s699_s24, %s743_s2 }
  0x65   : > { %p463_p10 = scmp.lt.u32.totalorder %s461_s6, %s457_s25  ;;  %p465_p6 = scmp.lt.u32.totalorder %s457_s25, %s699_s24 }
  0x66   : > { %p459_p12 = pnand %p458_p11, %p756_p13 }
  0x67   : > { %p464_p3 = por %p463_p10, %p462_p4 }
  0x68   : > { %p460_p2 = pneg %p459_p12 }
  0x69   : > { %p466_p7 = por %p465_p6, %p464_p3 }
  0x6b   : > { %p467_p5 = pnand %p466_p7, %p460_p2 }
  0x6d   : > { %470 = shalt.err (!%p467_p5)
}
  0x6e   : > { %335 = dma.vmem_to_hbm [thread:$0]  (%p756_p13), %s694_s16, 128, %s699_s24, %s204_s20  }
  0x6f PF: > { %s229_s30 = sand.u32 1, %s501_s9   ;;  %p757_p8 = scmp.ne.s32.totalorder %s749_s22, 0 }
  0x70   : > { %p758_p9 = scmp.ge.s32.totalorder %s513_s12, 2  ;;  %s230_s3 = scalar_lea.sflag [#allocation4], %s229_s30 }
  0x72   : > { %p345_p0 = pnand %p758_p9, %p757_p8 }
  0x74   : > { %496 = dma.done.wait (!%p345_p0), %s230_s3, 128  }
  0x75   : > { %498 = vsyncadd (!%p345_p0), %s230_s3, 4294967168  ;;  %p18_p1 = scmp.ge.s32.totalorder %s558_s15, 4   ;;  %s759_s9 = smov %s505_s10 }
  0x76   : > { %s760_s10 = smov %s509_s11  ;;  %s761_s11 = smov %s570_s18 }
  0x77   : > { %s762_s12 = smov %s558_s15  ;;  %20 = sbr.rel (!%p18_p1) target bundleno = 7 (0x7), region = 86 }
  0x7e   :  { %235 = vsyncpa [#allocation3], 1 }
  0x7f   :  { %237 = vsyncpa [#allocation3 + $0x1], 1 }
  0x80   :  { %238 = vsyncpa [#allocation6], 1 }
  0x81   :  { %240 = vsyncpa [#allocation6 + $0x1], 1 }
  0x82   :  { %241 = vsyncpa [#allocation4], 1 }
  0x83   :  { %243 = vsyncpa [#allocation4 + $0x1], 1 }

</bundles_post_ra>
